<compile_context>
chip_gen: v7x
topology: tpu7x:2x2x1
jax: 0.10.0
libtpu: 0.0.40
codegen_flags: <defaults>
</compile_context>

<pallas_src>
import jax
import jax.numpy as jnp
from jax import lax
from jax.experimental import pallas as pl
from jax.experimental.pallas import tpu as pltpu


def _round_up(x, m):
    return ((x + m - 1) // m) * m


def _make_koopman_kernel(din, hidden, n_z, k_du, r_b1, r_w2, r_b2):
    """Build the kernel with all shape/offset constants closed over (static).

    Refs (all VMEM, full blocks):
      xd_ref : [B, din]                 flattened [x0 ; d0]
      du_ref : [B, k_du]                flattened [d_0..d_{P-1}, u_0..u_{P-1}]
      enc_ref: [enc_rows, max(H,n_z)]   packed encoder params (8-aligned rows):
                 rows [0:din)        W1^T
                 row  r_b1           b1
                 rows [r_w2:r_w2+H)  W2^T
                 row  r_b2           b2
      m_ref  : [n_z + k_du, N_pad]      fused dynamics + readout block matrix
      out_ref: [B, N_pad]               [z_0..z_P | y_0..y_P | zero pad]
    """

    def kernel(xd_ref, du_ref, enc_ref, m_ref, out_ref):
        # ---- encoder: z0 = tanh([x0;d0] @ W1^T + b1) @ W2^T + b2 ----
        h = jnp.tanh(
            jnp.dot(xd_ref[...], enc_ref[0:din, 0:hidden],
                    preferred_element_type=jnp.float32)
            + enc_ref[r_b1:r_b1 + 1, 0:hidden])
        z0 = (jnp.dot(h, enc_ref[r_w2:r_w2 + hidden, 0:n_z],
                      preferred_element_type=jnp.float32)
              + enc_ref[r_b2:r_b2 + 1, 0:n_z])

        # ---- fused trajectory + readout: [z0 | du] @ M_full in two MXU calls
        #      (split on K avoids an in-kernel lane concat; no serial loop) ----
        out_ref[...] = (
            jnp.dot(z0, m_ref[0:n_z, :], preferred_element_type=jnp.float32)
            + jnp.dot(du_ref[...], m_ref[n_z:n_z + k_du, :],
                      preferred_element_type=jnp.float32))

    return kernel


def koopman_forward(x0, d0, d, u, params):
    """Mirrors KoopmanModel.forward(x0, d0, d, u).
       Returns (T_hat [B, P+1, n_y], z [B, P+1, n_z])."""
    f32 = jnp.float32
    hi = lax.Precision.HIGHEST

    B = x0.shape[0]
    P = u.shape[1]
    n_d = d.shape[2]
    n_u = u.shape[2]
    n_z = params["A"].shape[0]
    n_y = params["C"].shape[0]
    H = params["W1"].shape[0]
    din = params["W1"].shape[1]
    k_du = P * (n_d + n_u)

    # ---- data glue: flatten delay window and the full d/u history ----------
    xd = jnp.concatenate([x0.reshape(B, -1), d0.reshape(B, -1)], axis=1).astype(f32)
    du = jnp.concatenate([d.reshape(B, P * n_d).astype(f32),
                          u.reshape(B, P * n_u).astype(f32)], axis=1)

    # ---- pack encoder params into one slab (rows 8-aligned) -----------------
    wp = max(H, n_z)
    r_b1 = _round_up(din, 8)
    r_w2 = r_b1 + 8
    r_b2 = r_w2 + _round_up(H, 8)
    enc_rows = r_b2 + 8
    enc = jnp.zeros((enc_rows, wp), f32)
    enc = enc.at[0:din, 0:H].set(params["W1"].T.astype(f32))
    enc = enc.at[r_b1, 0:H].set(params["b1"].reshape(-1).astype(f32))
    enc = enc.at[r_w2:r_w2 + H, 0:n_z].set(params["W2"].T.astype(f32))
    enc = enc.at[r_b2, 0:n_z].set(params["b2"].reshape(-1).astype(f32))

    # ---- build fused dynamics + readout block matrix (HIGHEST precision) ----
    # z_k = z0 (A^T)^k + sum_{j<k} [d_j E^T + u_j B^T] (A^T)^{k-1-j}
    A_T = params["A"].T.astype(f32)
    E_T = params["E"].T.astype(f32)
    Bu_T = params["B"].T.astype(f32)
    C_T = params["C"].T.astype(f32)

    powers = [jnp.eye(n_z, dtype=f32)]
    for _ in range(P):
        powers.append(jnp.dot(powers[-1], A_T, precision=hi))

    Mz = jnp.concatenate(powers, axis=1)                          # [n_z, (P+1)*n_z]

    def hist_rows(g_t, n_in):
        blocks_all = []
        for j in range(P):
            blocks = [jnp.zeros((n_in, n_z), f32) if k <= j
                      else jnp.dot(g_t, powers[k - 1 - j], precision=hi)
                      for k in range(P + 1)]
            blocks_all.append(jnp.concatenate(blocks, axis=1))
        return jnp.concatenate(blocks_all, axis=0)                # [P*n_in, (P+1)*n_z]

    M = jnp.concatenate([Mz, hist_rows(E_T, n_d), hist_rows(Bu_T, n_u)], axis=0)
    Cbig = jnp.kron(jnp.eye(P + 1, dtype=f32), C_T)               # blockdiag(C^T)
    MC = jnp.dot(M, Cbig, precision=hi)                           # readout folded in

    Nz, Ny = (P + 1) * n_z, (P + 1) * n_y
    n_pad = _round_up(Nz + Ny, 128)                               # lane-dense output
    m_full = jnp.zeros((n_z + k_du, n_pad), f32)
    m_full = m_full.at[:, :Nz].set(M).at[:, Nz:Nz + Ny].set(MC)

    # ---- single gridless pallas_call (5 DMAs total) --------------------------
    kernel = _make_koopman_kernel(din, H, n_z, k_du, r_b1, r_w2, r_b2)
    vmem = pl.BlockSpec(memory_space=pltpu.MemorySpace.VMEM)
    out = pl.pallas_call(
        kernel,
        out_shape=jax.ShapeDtypeStruct((B, n_pad), f32),
        in_specs=[vmem, vmem, vmem, vmem],
        out_specs=vmem,
    )(xd, du, enc, m_full)

    z = out[:, :Nz].reshape(B, P + 1, n_z)
    T_hat = out[:, Nz:Nz + Ny].reshape(B, P + 1, n_y)
    return T_hat, z


def koopman_reference(x0, d0, d, u, params):
    """Pure-JAX reference (mirrors the PyTorch step-by-step loop)."""
    B = x0.shape[0]
    P = u.shape[1]
    hi = lax.Precision.HIGHEST
    xd = jnp.concatenate([x0.reshape(B, -1), d0.reshape(B, -1)], axis=1)
    h = jnp.tanh(jnp.dot(xd, params["W1"].T, precision=hi) + params["b1"])
    z_cur = jnp.dot(h, params["W2"].T, precision=hi) + params["b2"]
    zs, ys = [z_cur], []
    for i in range(P):
        ys.append(jnp.dot(z_cur, params["C"].T, precision=hi))
        z_cur = (jnp.dot(z_cur, params["A"].T, precision=hi)
                 + jnp.dot(d[:, i, :], params["E"].T, precision=hi)
                 + jnp.dot(u[:, i, :], params["B"].T, precision=hi))
        zs.append(z_cur)
    ys.append(jnp.dot(z_cur, params["C"].T, precision=hi))
    return jnp.stack(ys, axis=1), jnp.stack(zs, axis=1)


def make_params(key, din, hidden, n_z, n_d, n_u, n_y):
    ks = jax.random.split(key, 8)
    s = 0.2
    return {
        "W1": s * jax.random.normal(ks[0], (hidden, din), jnp.float32),
        "b1": s * jax.random.normal(ks[1], (1, hidden), jnp.float32),
        "W2": s * jax.random.normal(ks[2], (n_z, hidden), jnp.float32),
        "b2": s * jax.random.normal(ks[3], (1, n_z), jnp.float32),
        "A":  0.1 * jax.random.normal(ks[4], (n_z, n_z), jnp.float32),
        "B":  s * jax.random.normal(ks[5], (n_z, n_u), jnp.float32),
        "E":  s * jax.random.normal(ks[6], (n_z, n_d), jnp.float32),
        "C":  s * jax.random.normal(ks[7], (n_y, n_z), jnp.float32),
    }


if __name__ == "__main__":
    # small shapes consistent with the module
    B, TD1, n_x, n_d, n_u = 2, 3, 4, 2, 2     # time_delay + 1 = 3
    n_z, hidden, n_y, P = 32, 32, 1, 8        # latent size, hidden, output size, pred_steps

    key = jax.random.PRNGKey(0)
    kx, kd0, kd, ku, kp = jax.random.split(key, 5)
    x0 = jax.random.normal(kx, (B, TD1, n_x), jnp.float32)
    d0 = jax.random.normal(kd0, (B, TD1, n_d), jnp.float32)
    d = jax.random.normal(kd, (B, P, n_d), jnp.float32)
    u = jax.random.normal(ku, (B, P, n_u), jnp.float32)

    params = make_params(kp, din=TD1 * (n_x + n_d), hidden=hidden,
                         n_z=n_z, n_d=n_d, n_u=n_u, n_y=n_y)

    T_hat, z = jax.jit(koopman_forward)(x0, d0, d, u, params)
    jax.block_until_ready((T_hat, z))

    T_ref, z_ref = koopman_reference(x0, d0, d, u, params)

    assert T_hat.shape == (B, P + 1, n_y) and z.shape == (B, P + 1, n_z)
    assert jnp.allclose(T_hat, T_ref, atol=2e-3, rtol=2e-3)
    assert jnp.allclose(z, z_ref, atol=2e-3, rtol=2e-3)
    print("KERNEL_OK")
</pallas_src>

<mosaic_0001>
module attributes {stable_mosaic.version = 11 : i64} {
  func.func @kernel(%arg0: memref<2x18xf32, #tpu.memory_space<vmem>>, %arg1: memref<2x32xf32, #tpu.memory_space<vmem>>, %arg2: memref<72x32xf32, #tpu.memory_space<vmem>>, %arg3: memref<64x384xf32, #tpu.memory_space<vmem>>, %arg4: memref<2x384xf32, #tpu.memory_space<vmem>>) attributes {dimension_semantics = [], scalar_prefetch = 0 : i64, scratch_operands = 0 : i64, tpu.core_type = #tpu.core_type<tc>} {
    %c0 = arith.constant 0 : index
    %c0_0 = arith.constant 0 : index
    %0 = vector.load %arg0[%c0, %c0_0] : memref<2x18xf32, #tpu.memory_space<vmem>>, vector<2x18xf32>
    %c0_1 = arith.constant 0 : index
    %c0_2 = arith.constant 0 : index
    %1 = vector.load %arg2[%c0_1, %c0_2] : memref<72x32xf32, #tpu.memory_space<vmem>>, vector<18x32xf32>
    %cst = arith.constant dense<0.000000e+00> : vector<2x32xf32>
    %2 = tpu.matmul %0, %1, %cst {dimension_numbers = #tpu.dot_dimension_numbers<[1], [0], [0], [1], [0, 0, 1, 1], [], []>} : vector<2x18xf32>, vector<18x32xf32>, vector<2x32xf32> -> vector<2x32xf32>
    %c24 = arith.constant 24 : index
    %c0_3 = arith.constant 0 : index
    %3 = vector.load %arg2[%c24, %c0_3] : memref<72x32xf32, #tpu.memory_space<vmem>>, vector<1x32xf32>
    %4 = vector.broadcast %3 : vector<1x32xf32> to vector<2x32xf32>
    %5 = arith.addf %2, %4 : vector<2x32xf32>
    %6 = math.tanh %5 : vector<2x32xf32>
    %c32 = arith.constant 32 : index
    %c0_4 = arith.constant 0 : index
    %7 = vector.load %arg2[%c32, %c0_4] : memref<72x32xf32, #tpu.memory_space<vmem>>, vector<32x32xf32>
    %cst_5 = arith.constant dense<0.000000e+00> : vector<2x32xf32>
    %8 = tpu.matmul %6, %7, %cst_5 {dimension_numbers = #tpu.dot_dimension_numbers<[1], [0], [0], [1], [0, 0, 1, 1], [], []>} : vector<2x32xf32>, vector<32x32xf32>, vector<2x32xf32> -> vector<2x32xf32>
    %c64 = arith.constant 64 : index
    %c0_6 = arith.constant 0 : index
    %9 = vector.load %arg2[%c64, %c0_6] : memref<72x32xf32, #tpu.memory_space<vmem>>, vector<1x32xf32>
    %10 = vector.broadcast %9 : vector<1x32xf32> to vector<2x32xf32>
    %11 = arith.addf %8, %10 : vector<2x32xf32>
    %c0_7 = arith.constant 0 : index
    %c0_8 = arith.constant 0 : index
    %12 = vector.load %arg3[%c0_7, %c0_8] : memref<64x384xf32, #tpu.memory_space<vmem>>, vector<32x384xf32>
    %cst_9 = arith.constant dense<0.000000e+00> : vector<2x384xf32>
    %13 = tpu.matmul %11, %12, %cst_9 {dimension_numbers = #tpu.dot_dimension_numbers<[1], [0], [0], [1], [0, 0, 1, 1], [], []>} : vector<2x32xf32>, vector<32x384xf32>, vector<2x384xf32> -> vector<2x384xf32>
    %c0_10 = arith.constant 0 : index
    %c0_11 = arith.constant 0 : index
    %14 = vector.load %arg1[%c0_10, %c0_11] : memref<2x32xf32, #tpu.memory_space<vmem>>, vector<2x32xf32>
    %c32_12 = arith.constant 32 : index
    %c0_13 = arith.constant 0 : index
    %15 = vector.load %arg3[%c32_12, %c0_13] : memref<64x384xf32, #tpu.memory_space<vmem>>, vector<32x384xf32>
    %cst_14 = arith.constant dense<0.000000e+00> : vector<2x384xf32>
    %16 = tpu.matmul %14, %15, %cst_14 {dimension_numbers = #tpu.dot_dimension_numbers<[1], [0], [0], [1], [0, 0, 1, 1], [], []>} : vector<2x32xf32>, vector<32x384xf32>, vector<2x384xf32> -> vector<2x384xf32>
    %17 = arith.addf %13, %16 : vector<2x384xf32>
    %c0_15 = arith.constant 0 : index
    %c0_16 = arith.constant 0 : index
    %18 = vector.load %arg4[%c0_15, %c0_16] : memref<2x384xf32, #tpu.memory_space<vmem>>, vector<2x384xf32>
    tpu.vector_store %arg4[%c0_15, %c0_16], %17 {strides = array<i32>} : memref<2x384xf32, #tpu.memory_space<vmem>>, vector<2x384xf32>,
    return
  }
}

</mosaic_0001>

<bundles_post_ra>
// kernel: koopman_forward.1
= control target key start
LH: loop header
LB: loop body
LE: loop exit
PB: predicated region body
PF: predicated region fallthrough
CT: control target
= control target key end

     0   :  { %v643_v0 = vmov 0.0|0.0   ;;  %vm644_vm0 = vmmov 0   ;;  %v645_v3 = vmov 0.0   ;;  %vm30_vm1 = vcmask 1041408   ;;  %s803_s2 = inlined_call_operand.vmem [shape: f32[72,32], index: 2, kind: input, shape index: {}]   ;;  %s804_s0 = inlined_call_operand.vmem [shape: f32[2,18], index: 0, kind: input, shape index: {}]   ;;  %s805_s3 = inlined_call_operand.vmem [shape: f32[64,384], index: 3, kind: input, shape index: {}]   ;;  %s806_s1 = inlined_call_operand.vmem [shape: f32[2,32], index: 1, kind: input, shape index: {}]   ;;  %s807_s4 = inlined_call_operand.vmem [shape: f32[2,384], index: 4, kind: output, shape index: {}]  }
   0x1   :  { %596 = vmatprep.subr.bf16.mxu0 %v643_v0  ;;  %v18_v1 = vld [vmem:[%s803_s2] sm:$0xff]  ;;  %v19_v2 = vld [vmem:[%s803_s2 + $0x8] sm:$0xff]  ;;  %560 = vmatprep.mubr.msk.f32.mxu0 %vm644_vm0, %v645_v3  ;;  %v20_v5 = vld [vmem:[%s803_s2 + $0x10] sm:$0x3]  ;;  %vm26_vm2 = vcmask 146432   ;;  %vm114_vm3 = vcmask 261120   ;;  %v508_v61 = vlaneseq }
   0x2   :  { %v597_v4 = vpack.c.bf16 %v19_v2, %v18_v1  ;;  %599 = vmatprep.subr.bf16.mxu1 %v643_v0  ;;  %571 = vmatprep.mubr.msk.f32.mxu1 %vm644_vm0, %v645_v3  ;;  %v17_v6 = vld [vmem:[%s804_s0] sm:$0x3]  ;;  %v106_v8 = vld [vmem:[%s803_s2 + $0x28] sm:$0xff]  ;;  %v107_v9 = vld [vmem:[%s803_s2 + $0x30] sm:$0xff]  ;;  %v646_v59 = vmov 1983009808  }
   0x3   :  { %v105_v7 = vld [vmem:[%s803_s2 + $0x20] sm:$0xff]  ;;  %v108_v11 = vld [vmem:[%s803_s2 + $0x38] sm:$0xff]  ;;  %v202_v13 = vld [vmem:[%s805_s3 + $0x68] sm:$0xff]  ;;  %v506_v60 = vunpack.c.l.s4 %v646_v59  ;;  %v509_v63 = vshrl.u32 %v508_v61, 7 }
   0x4   :  { %598 = vmatpush3.bf16.msra.mxu0 %v597_v4  ;;  %v600_v10 = vpack.c.bf16 %v106_v8, %v105_v7  ;;  %v603_v12 = vpack.c.bf16 %v108_v11, %v107_v9  ;;  %v205_v14 = vld [vmem:[%s805_s3 + $0x80] sm:$0xff]  ;;  %v204_v17 = vld [vmem:[%s805_s3 + $0x78] sm:$0xff]  ;;  %v211_v20 = vld [vmem:[%s805_s3 + $0xb0] sm:$0xff] }
   0x5   :  { %558 = vmatprep.subr.mxu0 %v645_v3  ;;  %v201_v15 = vld [vmem:[%s805_s3 + $0x60] sm:$0xff]  ;;  %v605_v16 = vpack.c.bf16 %v205_v14, %v202_v13  ;;  %v208_v19 = vld [vmem:[%s805_s3 + $0x98] sm:$0xff]  ;;  %v207_v21 = vld [vmem:[%s805_s3 + $0x90] sm:$0xff]  ;;  %v507_v62 = vunpack.c.0.s8 %v506_v60 }
   0x6   :  { %601 = vmatpush3.bf16.msra.mxu1 %v600_v10  ;;  %v607_v18 = vpack.c.bf16 %v204_v17, %v201_v15  ;;  %v609_v22 = vpack.c.bf16 %v211_v20, %v208_v19  ;;  %v210_v23 = vld [vmem:[%s805_s3 + $0xa8] sm:$0xff]  ;;  %v192_v26 = vld [vmem:[%s805_s3 + $0x20] sm:$0xff]  ;;  %v191_v29 = vld [vmem:[%s805_s3 + $0x18] sm:$0xff] }
   0x7   :  { %602 = vmatprep.subr.bf16.mxu1 %v643_v0  ;;  %v611_v24 = vpack.c.bf16 %v210_v23, %v207_v21  ;;  %v189_v25 = vld [vmem:[%s805_s3 + $0x8] sm:$0xff]  ;;  %v188_v28 = vld [vmem:[%s805_s3] sm:$0xff]  ;;  %v195_v32 = vld [vmem:[%s805_s3 + $0x38] sm:$0xff]  ;;  %v510_v2 = vsub.s32 %v507_v62, %v509_v63 }
   0x8   :  { %559 = vmatpush3.msk.msra.mxu0 %vm30_vm1, %v20_v5  ;;  %v619_v27 = vpack.c.bf16 %v192_v26, %v189_v25  ;;  %v200_v30 = vld [vmem:[%s806_s1] sm:$0x3]  ;;  %v621_v31 = vpack.c.bf16 %v191_v29, %v188_v28  ;;  %v198_v33 = vld [vmem:[%s805_s3 + $0x50] sm:$0xff]  ;;  %v197_v36 = vld [vmem:[%s805_s3 + $0x48] sm:$0xff] }
   0x9   :  { %561 = vmatmul.mubr.msk.f32.vlgmr.msra.gmra.mrb[0].mxu0 %vm26_vm2, %v17_v6  ;;  %606 = vmatprep.subr.bf16.mxu0 %v605_v16  ;;  %v623_v34 = vpack.c.bf16 %v198_v33, %v195_v32  ;;  %v194_v35 = vld [vmem:[%s805_s3 + $0x30] sm:$0xff]  ;;  %v526_v38 = vld [vmem:[%s803_s2 + $0x18] ss:$0 sm:$0xff]  ;;  %v206_v43 = vld [vmem:[%s805_s3 + $0x88] sm:$0xff] }
   0xa   :  { %280 = vmatprep.mubr.f32.mxu0 %v645_v3  ;;  %604 = vmatpush3.bf16.msra.mxu1 %v603_v12  ;;  %v625_v37 = vpack.c.bf16 %v197_v36, %v194_v35  ;;  %v203_v42 = vld [vmem:[%s805_s3 + $0x70] sm:$0xff]  ;;  %v209_v45 = vld [vmem:[%s805_s3 + $0xa0] sm:$0xff]  ;;  %v212_v46 = vld [vmem:[%s805_s3 + $0xb8] sm:$0xff] }
   0xb   :  { %613 = vmatprep.subr.bf16.mxu1 %v643_v0  ;;  %608 = vmatpush1.bf16.msra.mxu0 %v607_v18  ;;  %v614_v44 = vpack.c.bf16 %v206_v43, %v203_v42  ;;  %v617_v48 = vpack.c.bf16 %v212_v46, %v209_v45  ;;  %v190_v49 = vld [vmem:[%s805_s3 + $0x10] sm:$0xff]  ;;  %v193_v50 = vld [vmem:[%s805_s3 + $0x28] sm:$0xff]  ;;  %v196_v52 = vld [vmem:[%s805_s3 + $0x40] sm:$0xff] }
   0xc   :  { %610 = vmatprep.subr.bf16.mxu0 %v609_v22  ;;  %v628_v51 = vpack.c.bf16 %v193_v50, %v190_v49  ;;  %v199_v53 = vld [vmem:[%s805_s3 + $0x58] sm:$0xff]  ;;  %v529_v55 = vld [vmem:[%s803_s2 + $0x40] ss:$0 sm:$0xff] }
   0xd   :  { %v631_v54 = vpack.c.bf16 %v199_v53, %v196_v52 }
   0xf   :  { %612 = vmatpush1.bf16.msra.mxu0 %v611_v24 }
  0x10   :  { %620 = vmatprep.subr.bf16.mxu0 %v619_v27 }
  0x12   :  { %531 = vmatmul.mubr.msk.f32.vlgmr.msra.gmra.mrb[2].mxu0 %vm114_vm3, %v200_v30 }
  0x13   :  { %622 = vmatpush1.bf16.msra.mxu0 %v621_v31  ;;  %424 = vmatprep.mubr.f32.mxu0 %v645_v3 }
  0x14   :  { %624 = vmatprep.subr.bf16.mxu0 %v623_v34 }
  0x17   :  { %626 = vmatpush1.bf16.msra.mxu0 %v625_v37 }
  0xdc   :  { %v100_v39 = vpop.f32.mrb[0].mxu0 }
  0xdd   :  { %v101_v40 = vadd.f32 %v526_v38, %v100_v39  ;;  %v562_v41 = vpop.f32.mrb[1].mxu0 }
  0xdf   :  { %641 = vtanh.f32 %v101_v40 }
  0xe9   :  { %v642_v47 = vpop.eup %641 }
  0xea   :  { %572 = vmatmul.mubr.msk.f32.vlgmr.msra.gmra.mrb[0].mxu1 %vm114_vm3, %v642_v47 }
  0xeb   :  { %615 = vmatpush3.bf16.msra.mxu1 %v614_v44  ;;  %582 = vmatprep.mubr.msk.f32.mxu1 %vm644_vm0, %v645_v3 }
  0xec   :  { %616 = vmatprep.subr.bf16.mxu1 %v643_v0 }
  0xef   :  { %618 = vmatpush3.bf16.msra.mxu1 %v617_v48 }
  0xf0   :  { %627 = vmatprep.subr.bf16.mxu1 %v643_v0 }
  0xf2   :  { %583 = vmatmul.mubr.msk.f32.vlgmr.msra.gmra.mrb[2].mxu1 %vm114_vm3, %v200_v30 }
  0xf3   :  { %629 = vmatpush3.bf16.msra.mxu1 %v628_v51  ;;  %593 = vmatprep.mubr.msk.f32.mxu1 %vm644_vm0, %v645_v3 }
  0xf4   :  { %630 = vmatprep.subr.bf16.mxu1 %v643_v0 }
  0xf7   :  { %632 = vmatpush3.bf16.msra.mxu1 %v631_v54 }
 0x1bd   :  { %v184_v56 = vpop.f32.mrb[0].mxu1 }
 0x1be   :  { %v185_v57 = vadd.f32 %v529_v55, %v184_v56  ;;  %v573_v58 = vpop.f32.mrb[1].mxu1 }
 0x1c0   :  { %533 = vmatmul.mubr.msk.f32.vlgmr.msra.gmra.mrb[2].mxu0 %vm114_vm3, %v185_v57  ;;  %594 = vmatmul.mubr.msk.f32.vlgmr.msra.gmra.mrb[2].mxu1 %vm114_vm3, %v185_v57 }
 0x293   :  { %v426_v0 = vpop.f32.mrb[2].mxu0  ;;  %v497_v1 = vpop.f32.mrb[2].mxu1 }
 0x294   :  { %v428_v3 = vpop.f32.mrb[3].mxu0  ;;  %v595_v4 = vpop.f32.mrb[3].mxu1  ;;  %v518_v6 = vrot.slane %v497_v1, %v510_v2 }
 0x295   :  { %v504_v5 = vcombine.low %v426_v0, %v428_v3 }
 0x297   :  { %v511_v7 = vrot.slane %v504_v5, %v510_v2 }
 0x299   :  { %v519_v8 = vcombine.low %v511_v7, %v518_v6 }
 0x29b   :  { %521 = vst [vmem:[%s807_s4] sm:$0x3f] %v519_v8 }

</bundles_post_ra>
